<compile_context>
chip_gen: v6e
topology: v6e:2x2x1
jax: 0.10.0
libtpu: 0.0.40
codegen_flags: <defaults>
</compile_context>

<pallas_src>
import functools

import jax
import jax.numpy as jnp
from jax import lax
from jax.experimental import pallas as pl
from jax.experimental.pallas import tpu as pltpu

_LANES = 128
_SUBLANES = 8
_NUM_CORES = 2                       # leading "parallel" grid axis (v7x megacore)
_DEFAULT_BLOCK_BYTES = 2 * 1024 * 1024   # per-input block size target (~2 MiB)


def _mse_kernel(yhat_ref, y_ref, out_ref, acc_ref, *,
                rows: int, tile_rows: int, tiles_per_core: int, need_mask: bool):
    """Streaming sum((yhat - y)^2) into a (8,128) vreg-shaped accumulator."""
    c = pl.program_id(0)   # core / parallel axis
    i = pl.program_id(1)   # serial reduction axis

    @pl.when(i == 0)
    def _init():
        acc_ref[...] = jnp.zeros_like(acc_ref)

    # Cast to f32 in-kernel (halves HBM traffic for bf16/fp16 inputs).
    d = yhat_ref[...].astype(jnp.float32) - y_ref[...].astype(jnp.float32)
    dsq = d * d

    if need_mask:
        # Zero every row whose global row index is past the valid data; this
        # covers both the ragged last tile and clamped "ghost" tiles from the
        # core split.  Masking dsq (not the inputs) is sufficient because the
        # select discards any garbage/NaN produced from OOB reads.
        tile_idx = c * tiles_per_core + i
        local_row = lax.broadcasted_iota(jnp.int32, (tile_rows, _LANES), 0)
        valid = (tile_idx * tile_rows + local_row) < rows
        dsq = jnp.where(valid, dsq, 0.0)

    # Pure VPU adds: fold the tile onto one vreg worth of partial sums.
    acc_ref[...] += dsq.reshape(tile_rows // _SUBLANES, _SUBLANES, _LANES).sum(axis=0)

    @pl.when(i == pl.num_programs(1) - 1)
    def _finalize():
        # One cross-sublane reduce per core; lane reduce + divide happen in the
        # (tiny) wrapper epilogue so the kernel output stays lane-dense.
        out_ref[...] = jnp.sum(acc_ref[...], axis=0, keepdims=True)


@functools.partial(jax.jit, static_argnames=("block_bytes",))
def mse_pallas(yhat: jax.Array, y: jax.Array, *,
               block_bytes: int = _DEFAULT_BLOCK_BYTES) -> jax.Array:
    """mean((yhat - y)^2) over all elements. Returns a 0-d float32 JAX array."""
    assert yhat.shape == y.shape, (yhat.shape, y.shape)
    n_elems = yhat.size
    assert n_elems > 0

    # Lane-dense (rows, 128) view.  Aligned sizes (numel % 128 == 0, >= 8 rows)
    # take the zero-copy reshape path; masking handles any ragged last tile.
    rows_exact = pl.cdiv(n_elems, _LANES)
    if n_elems == rows_exact * _LANES and rows_exact >= _SUBLANES:
        rows, pad = rows_exact, 0
    else:
        # TODO(synk): a sub-128 ragged tail still costs one full-array zero-pad
        # copy; zeros contribute 0 to the sum so no extra masking is needed.
        rows = max(pl.cdiv(rows_exact, _SUBLANES) * _SUBLANES, _SUBLANES)
        pad = rows * _LANES - n_elems

    def to_2d(a):
        a = a.reshape(-1)
        if pad:
            a = jnp.pad(a, (0, pad))
        return a.reshape(rows, _LANES)   # original dtype; cast in-kernel

    # Tile height: ~block_bytes per input block, multiple of 8 sublanes.
    itemsize = max(jnp.dtype(yhat.dtype).itemsize, jnp.dtype(y.dtype).itemsize)
    target_rows = max(_SUBLANES,
                      (block_bytes // (_LANES * itemsize)) // _SUBLANES * _SUBLANES)
    tile_rows = min(target_rows, pl.cdiv(rows, _SUBLANES) * _SUBLANES)

    tiles_total = pl.cdiv(rows, tile_rows)
    num_cores = _NUM_CORES if tiles_total >= _NUM_CORES else 1
    tiles_per_core = pl.cdiv(tiles_total, num_cores)
    need_mask = num_cores * tiles_per_core * tile_rows > rows

    last_block = tiles_total - 1

    def in_map(c, i):
        # Clamp ghost tiles (core-split remainder) onto the last real block;
        # the in-kernel mask zeroes their contribution.
        return (jnp.minimum(c * tiles_per_core + i, last_block), 0)

    kernel = functools.partial(_mse_kernel, rows=rows, tile_rows=tile_rows,
                               tiles_per_core=tiles_per_core, need_mask=need_mask)

    partials = pl.pallas_call(
        kernel,
        out_shape=jax.ShapeDtypeStruct((num_cores, _LANES), jnp.float32),
        grid=(num_cores, tiles_per_core),
        in_specs=[
            pl.BlockSpec((tile_rows, _LANES), in_map),
            pl.BlockSpec((tile_rows, _LANES), in_map),
        ],
        out_specs=pl.BlockSpec((1, _LANES), lambda c, i: (c, 0)),
        scratch_shapes=[pltpu.VMEM((_SUBLANES, _LANES), jnp.float32)],
        compiler_params=pltpu.CompilerParams(
            dimension_semantics=("parallel", "arbitrary"),
            vmem_limit_bytes=32 * 1024 * 1024,
        ),
    )(to_2d(yhat), to_2d(y))

    return jnp.sum(partials, dtype=jnp.float32) / jnp.float32(n_elems)


class MSE:
    """Mirrors the torch module: forward returns a python float (host sync)."""

    def forward(self, yhat, y):
        # torch's .detach() -> stop_gradient (no-op here, no autodiff graph).
        loss = mse_pallas(lax.stop_gradient(yhat), y)
        # .cpu().numpy().item() equivalent — the only forced sync.
        return float(jax.device_get(loss))


if __name__ == "__main__":
    key = jax.random.PRNGKey(0)
    k1, k2, k3, k4 = jax.random.split(key, 4)

    # Small regression-style inputs: (batch=2, channels=4, spatial=16x16).
    shape = (2, 4, 16, 16)
    y = jax.random.normal(k1, shape, dtype=jnp.float32)
    yhat = y + 0.3 * jax.random.normal(k2, shape, dtype=jnp.float32)
    ref = jnp.mean((yhat - y) ** 2)

    # Default big blocks (single grid step at this size, zero-copy layout).
    loss = mse_pallas(yhat, y)
    jax.block_until_ready(loss)
    assert abs(float(loss) - float(ref)) < 1e-5, (float(loss), float(ref))

    # Tiny blocks -> multi-tile grid exercising the 2-way "parallel" core axis.
    loss_small = mse_pallas(yhat, y, block_bytes=_SUBLANES * _LANES * 4)
    jax.block_until_ready(loss_small)
    assert abs(float(loss_small) - float(ref)) < 1e-5, (float(loss_small), float(ref))

    # Ragged size -> pad path + in-kernel tail masking + clamped ghost tiles.
    n = 3001
    a = jax.random.normal(k3, (n,), dtype=jnp.float32)
    b = a + 0.1 * jax.random.normal(k4, (n,), dtype=jnp.float32)
    ref2 = jnp.mean((a - b) ** 2)
    loss2 = mse_pallas(a, b, block_bytes=_SUBLANES * _LANES * 4)
    jax.block_until_ready(loss2)
    assert abs(float(loss2) - float(ref2)) < 1e-5, (float(loss2), float(ref2))

    # bf16 inputs: kept narrow in HBM, upcast in-kernel.
    yb, yhb = y.astype(jnp.bfloat16), yhat.astype(jnp.bfloat16)
    ref3 = jnp.mean((yhb.astype(jnp.float32) - yb.astype(jnp.float32)) ** 2)
    loss3 = mse_pallas(yhb, yb)
    jax.block_until_ready(loss3)
    assert abs(float(loss3) - float(ref3)) < 1e-5, (float(loss3), float(ref3))

    # Module-style forward (python float, matches torch .item()).
    m = MSE()
    loss_float = m.forward(yhat, y)
    assert abs(loss_float - float(ref)) < 1e-5, (loss_float, float(ref))

    print("KERNEL_OK")
</pallas_src>

<mosaic_0001>
module attributes {stable_mosaic.version = 11 : i64} {
  func.func @_mse_kernel(%arg0: i32, %arg1: i32, %arg2: memref<16x128xf32, #tpu.memory_space<vmem>>, %arg3: memref<16x128xf32, #tpu.memory_space<vmem>>, %arg4: memref<1x128xf32, #tpu.memory_space<vmem>>, %arg5: memref<8x128xf32, #tpu.memory_space<vmem>>) attributes {dimension_semantics = [#tpu.dimension_semantics<parallel>, #tpu.dimension_semantics<arbitrary>], iteration_bounds = array<i64: 1, 1>, scalar_prefetch = 0 : i64, scratch_operands = 1 : i64, tpu.core_type = #tpu.core_type<tc>, window_params = [{transform_indices = @transform_0, window_bounds = array<i64: 16, 128>}, {transform_indices = @transform_1, window_bounds = array<i64: 16, 128>}, {transform_indices = @transform_2, window_bounds = array<i64: 1, 128>}]} {
    %c0_i32 = arith.constant 0 : i32
    %0 = arith.cmpi eq, %arg1, %c0_i32 : i32
    %1 = arith.extui %0 : i1 to i32
    %c0_i32_0 = arith.constant 0 : i32
    %2 = arith.cmpi ne, %1, %c0_i32_0 : i32
    scf.if %2 {
      %cst_10 = arith.constant 0.000000e+00 : f32
      %15 = vector.broadcast %cst_10 : f32 to vector<8x128xf32>
      %c0_11 = arith.constant 0 : index
      %c0_12 = arith.constant 0 : index
      %16 = vector.load %arg5[%c0_11, %c0_12] : memref<8x128xf32, #tpu.memory_space<vmem>>, vector<8x128xf32>
      tpu.vector_store %arg5[%c0_11, %c0_12], %15 {strides = array<i32>} : memref<8x128xf32, #tpu.memory_space<vmem>>, vector<8x128xf32>,
    } else {
    }
    %c0 = arith.constant 0 : index
    %c0_1 = arith.constant 0 : index
    %3 = vector.load %arg2[%c0, %c0_1] : memref<16x128xf32, #tpu.memory_space<vmem>>, vector<16x128xf32>
    %c0_2 = arith.constant 0 : index
    %c0_3 = arith.constant 0 : index
    %4 = vector.load %arg3[%c0_2, %c0_3] : memref<16x128xf32, #tpu.memory_space<vmem>>, vector<16x128xf32>
    %5 = arith.subf %3, %4 : vector<16x128xf32>
    %6 = arith.mulf %5, %5 : vector<16x128xf32>
    %c0_4 = arith.constant 0 : index
    %c0_5 = arith.constant 0 : index
    %7 = vector.load %arg5[%c0_4, %c0_5] : memref<8x128xf32, #tpu.memory_space<vmem>>, vector<8x128xf32>
    %8 = vector.shape_cast %6 : vector<16x128xf32> to vector<2x8x128xf32>
    %cst = arith.constant dense<0.000000e+00> : vector<8x128xf32>
    %9 = vector.multi_reduction <add>, %8, %cst [0] : vector<2x8x128xf32> to vector<8x128xf32>
    %10 = arith.addf %7, %9 : vector<8x128xf32>
    %c0_6 = arith.constant 0 : index
    %c0_7 = arith.constant 0 : index
    %11 = vector.load %arg5[%c0_6, %c0_7] : memref<8x128xf32, #tpu.memory_space<vmem>>, vector<8x128xf32>
    tpu.vector_store %arg5[%c0_6, %c0_7], %10 {strides = array<i32>} : memref<8x128xf32, #tpu.memory_space<vmem>>, vector<8x128xf32>,
    %c0_i32_8 = arith.constant 0 : i32
    %12 = arith.cmpi eq, %arg1, %c0_i32_8 : i32
    %13 = arith.extui %12 : i1 to i32
    %c0_i32_9 = arith.constant 0 : i32
    %14 = arith.cmpi ne, %13, %c0_i32_9 : i32
    scf.if %14 {
      %c0_10 = arith.constant 0 : index
      %c0_11 = arith.constant 0 : index
      %15 = vector.load %arg5[%c0_10, %c0_11] : memref<8x128xf32, #tpu.memory_space<vmem>>, vector<8x128xf32>
      %cst_12 = arith.constant dense<0.000000e+00> : vector<128xf32>
      %16 = vector.multi_reduction <add>, %15, %cst_12 [0] : vector<8x128xf32> to vector<128xf32>
      %17 = vector.shape_cast %16 : vector<128xf32> to vector<1x128xf32>
      %c0_13 = arith.constant 0 : index
      %c0_14 = arith.constant 0 : index
      %18 = vector.load %arg4[%c0_13, %c0_14] : memref<1x128xf32, #tpu.memory_space<vmem>>, vector<1x128xf32>
      tpu.vector_store %arg4[%c0_13, %c0_14], %17 {strides = array<i32>} : memref<1x128xf32, #tpu.memory_space<vmem>>, vector<1x128xf32>,
    } else {
    }
    return
  }
  func.func @transform_0(%arg0: i32, %arg1: i32) -> (i32, i32) {
    %c1_i32 = arith.constant 1 : i32
    %0 = arith.muli %arg0, %c1_i32 : i32
    %1 = arith.addi %0, %arg1 : i32
    %c0_i32 = arith.constant 0 : i32
    %2 = arith.minsi %1, %c0_i32 : i32
    %c0_i32_0 = arith.constant 0 : i32
    %c0_i32_1 = arith.constant 0 : i32
    return %2, %c0_i32_0 : i32, i32
  }
  func.func @transform_1(%arg0: i32, %arg1: i32) -> (i32, i32) {
    %c1_i32 = arith.constant 1 : i32
    %0 = arith.muli %arg0, %c1_i32 : i32
    %1 = arith.addi %0, %arg1 : i32
    %c0_i32 = arith.constant 0 : i32
    %2 = arith.minsi %1, %c0_i32 : i32
    %c0_i32_0 = arith.constant 0 : i32
    %c0_i32_1 = arith.constant 0 : i32
    return %2, %c0_i32_0 : i32, i32
  }
  func.func @transform_2(%arg0: i32, %arg1: i32) -> (i32, i32) {
    %c0_i32 = arith.constant 0 : i32
    %c0_i32_0 = arith.constant 0 : i32
    return %arg0, %c0_i32 : i32, i32
  }
}

</mosaic_0001>

<bundles_post_ra>
// kernel: mse_pallas.1
= control target key start
LH: loop header
LB: loop body
LE: loop exit
PB: predicated region body
PF: predicated region fallthrough
CT: control target
= control target key end

     0   :  { %s149_s0 = inlined_call_operand.vmem [shape: f32[16,128], index: 0, kind: input, shape index: {}]   ;;  %s150_s1 = inlined_call_operand.vmem [shape: f32[16,128], index: 1, kind: input, shape index: {}]   ;;  %s151_s2 = inlined_call_operand.vmem [shape: f32[1,128], index: 2, kind: output, shape index: {}]  }
   0x1   :  { %v80_v0 = vld [vmem:[%s149_s0] sm:$0xff]  ;;  %v81_v1 = vld [vmem:[%s149_s0 + $0x8] sm:$0xff] }
   0x2   :  { %v82_v2 = vld [vmem:[%s150_s1] sm:$0xff]  ;;  %v83_v3 = vld [vmem:[%s150_s1 + $0x8] sm:$0xff] }
   0x3   :  { %v84_v4 = vsub.f32 %v80_v0, %v82_v2  ;;  %v85_v5 = vsub.f32 %v81_v1, %v83_v3 }
   0x5   :  { %v86_v6 = vmul.f32 %v84_v4, %v84_v4  ;;  %v87_v7 = vmul.f32 %v85_v5, %v85_v5 }
   0x7   :  { %v89_v8 = vadd.f32 %v87_v7, %v86_v6 }
   0x9   :  { %v96_v9 = vrot.slane %v89_v8, 4 }
   0xb   :  { %v97_v10 = vadd.f32 %v96_v9, %v89_v8 }
   0xd   :  { %v98_v11 = vrot.slane %v97_v10, 2 }
   0xf   :  { %v99_v12 = vadd.f32 %v98_v11, %v97_v10 }
  0x11   :  { %v100_v13 = vrot.slane %v99_v12, 1 }
  0x13   :  { %v101_v14 = vadd.f32 %v100_v13, %v99_v12 }
  0x15   :  { %102 = vst [vmem:[%s151_s2] sm:$0x1] %v101_v14 }

</bundles_post_ra>
